<compile_context>
chip_gen: v7x
topology: tpu7x:2x2x1
jax: 0.10.0
libtpu: 0.0.40
codegen_flags: <defaults>
</compile_context>

<pallas_src>
import functools

import jax
import jax.numpy as jnp
import numpy as np
from jax.experimental import pallas as pl
from jax.experimental.pallas import tpu as pltpu


def _prototype_kernel(x_ref, mask_ref, g_ref, w1_ref, b1_ref, w2_ref, b2_ref,
                      out_ref, pos_sum_ref, tot_sum_ref, pos_cnt_ref,
                      *, label_size, total_batch, has_tail):
    L = label_size
    b = pl.program_id(0)
    nb = pl.num_programs(0)

    @pl.when(b == 0)
    def _init():
        pos_sum_ref[...] = jnp.zeros_like(pos_sum_ref)
        tot_sum_ref[...] = jnp.zeros_like(tot_sum_ref)
        pos_cnt_ref[...] = jnp.zeros_like(pos_cnt_ref)

    # Cast in-kernel (x may arrive as bf16 -> halves HBM traffic); accumulate f32.
    x = x_ref[...].astype(jnp.float32)        # [TB, L, E]
    m = mask_ref[...].astype(jnp.float32)     # [TB, L, 1]  (1.0 if label present)

    if has_tail:
        # Last batch tile may over-read past B; zero out the out-of-range rows.
        tb = x.shape[0]
        row = jax.lax.broadcasted_iota(jnp.int32, (tb, 1, 1), 0) + b * tb
        valid = row < total_batch
        x = jnp.where(valid, x, 0.0)
        m = jnp.where(valid, m, 0.0)

    # Partial masked sums over this batch tile, accumulated in VMEM scratch.
    pos_sum_ref[...] += jnp.sum(m * x, axis=0)     # [L, E]
    tot_sum_ref[...] += jnp.sum(x, axis=0)         # [L, E]
    pos_cnt_ref[...] += jnp.sum(m, axis=0)         # [L, 1]

    @pl.when(b == nb - 1)
    def _finalize():
        pos_sum = pos_sum_ref[...]
        tot_sum = tot_sum_ref[...]
        pos_cnt = pos_cnt_ref[...]

        anti_sum = tot_sum - pos_sum
        anti_cnt = jnp.float32(total_batch) - pos_cnt

        pos_mean = pos_sum / jnp.maximum(pos_cnt, 1.0)
        anti_mean = anti_sum / jnp.maximum(anti_cnt, 1.0)

        g = g_ref[...].astype(jnp.float32)         # [L+1, E]
        g_pos = g[:L, :]                           # [L, E]
        g_anti = g[L:L + 1, :]                     # [1, E]  (global_prototype[-1])

        avg_pos = 0.5 * pos_mean + 0.5 * g_pos             # [L, E]
        avg_anti = 0.5 * anti_mean + 0.5 * g_anti          # [L, E] (broadcast)

        w1 = w1_ref[...]                           # [E, H]
        b1 = b1_ref[...]                           # [1, H]
        w2 = w2_ref[...]                           # [H, E]
        b2 = b2_ref[...]                           # [1, E]

        # Shared 2-layer MLP for positive and anti averages in one MXU pass.
        a = jnp.concatenate([avg_pos, avg_anti], axis=0)   # [2L, E]
        h = jnp.maximum(
            jnp.dot(a, w1, preferred_element_type=jnp.float32) + b1, 0.0)
        p = jnp.dot(h, w2, preferred_element_type=jnp.float32) + b2   # [2L, E]

        p_pos = p[:L, :]
        p_anti = p[L:, :]

        # Labels with no positive examples keep their zero row.
        pos_out = jnp.where(pos_cnt > 0.0, p_pos, 0.0)     # [L, E]

        # Anti prototype = mean over labels that had >=1 anti example (guarded).
        anti_valid = (anti_cnt > 0.0).astype(jnp.float32)              # [L, 1]
        n_valid = jnp.sum(anti_valid, axis=0, keepdims=True)           # [1, 1]
        anti_row = (jnp.sum(p_anti * anti_valid, axis=0, keepdims=True)
                    / jnp.maximum(n_valid, 1.0))                       # [1, E]

        # Store directly into the output slices (no concatenate).
        out_ref[pl.ds(0, L), :] = pos_out.astype(out_ref.dtype)
        out_ref[pl.ds(L, 1), :] = anti_row.astype(out_ref.dtype)


def prototype_forward(x, mask, global_prototype, w1t, b1, w2t, b2, *,
                      block_b=None):
    """Prototype.forward.

    x:    [B, L, E] (any float dtype; cast to f32 inside the kernel)
    mask: [B, L]    (1.0 if label l is in batch['label_list'][idx])
    global_prototype: [L+1, E]
    w1t: [E, H], b1: [H]   (hidden_layer weight, pre-transposed)
    w2t: [H, E], b2: [E]   (prototype_layer weight, pre-transposed)
    Returns [L+1, E] float32 prototype embeddings.
    """
    B, L, E = x.shape
    H = w1t.shape[1]

    if block_b is None:
        # Target ~8 MiB per x block (Pallas double-buffers it); v7x has only
        # 64 MiB physical VMEM so keep the per-block footprint modest.
        bytes_per_row = L * E * jnp.dtype(x.dtype).itemsize
        block_b = int(max(1, min(B, (8 * 1024 * 1024) // max(bytes_per_row, 1))))
    nb = pl.cdiv(B, block_b)

    mask3 = mask.astype(jnp.float32).reshape(B, L, 1)
    b1r = b1.astype(jnp.float32).reshape(1, H)
    b2r = b2.astype(jnp.float32).reshape(1, E)

    kernel = functools.partial(
        _prototype_kernel,
        label_size=L,
        total_batch=B,
        has_tail=(B % block_b) != 0)

    return pl.pallas_call(
        kernel,
        out_shape=jax.ShapeDtypeStruct((L + 1, E), jnp.float32),
        grid=(nb,),
        in_specs=[
            pl.BlockSpec((block_b, L, E), lambda b: (b, 0, 0)),
            pl.BlockSpec((block_b, L, 1), lambda b: (b, 0, 0)),
            pl.BlockSpec((L + 1, E), lambda b: (0, 0)),
            pl.BlockSpec((E, H), lambda b: (0, 0)),
            pl.BlockSpec((1, H), lambda b: (0, 0)),
            pl.BlockSpec((H, E), lambda b: (0, 0)),
            pl.BlockSpec((1, E), lambda b: (0, 0)),
        ],
        out_specs=pl.BlockSpec((L + 1, E), lambda b: (0, 0)),
        scratch_shapes=[
            pltpu.VMEM((L, E), jnp.float32),   # pos_sum accumulator
            pltpu.VMEM((L, E), jnp.float32),   # tot_sum accumulator
            pltpu.VMEM((L, 1), jnp.float32),   # pos_cnt accumulator
        ],
        compiler_params=pltpu.CompilerParams(
            # Batch axis carries accumulators + resident output -> arbitrary.
            dimension_semantics=("arbitrary",),
            vmem_limit_bytes=40 * 1024 * 1024),
    )(x, mask3, global_prototype.astype(jnp.float32), w1t, b1r, w2t, b2r)


def _reference_numpy(x, label_list, g, w1, b1, w2, b2):
    """Direct port of the PyTorch forward (loops + lists) for validation."""
    x = np.asarray(x, np.float32)
    g = np.asarray(g, np.float32)
    w1 = np.asarray(w1, np.float32); b1 = np.asarray(b1, np.float32)
    w2 = np.asarray(w2, np.float32); b2 = np.asarray(b2, np.float32)
    B, L, E = x.shape

    def mlp(v):
        h = np.maximum(v @ w1.T + b1, 0.0)
        return h @ w2.T + b2

    proto = np.zeros((L, E), np.float32)
    anti_list = []
    for i in range(L):
        pos, anti = [], []
        for idx, labels in enumerate(label_list):
            (pos if i in labels else anti).append(x[idx, i, :])
        if pos:
            avg = 0.5 * np.mean(np.stack(pos), axis=0) + 0.5 * g[i]
            proto[i, :] = mlp(avg)
        if anti:
            avg = 0.5 * np.mean(np.stack(anti), axis=0) + 0.5 * g[-1]
            anti_list.append(mlp(avg))
    anti_proto = np.mean(np.stack(anti_list), axis=0)
    return np.concatenate([proto, anti_proto[None, :]], axis=0)


if __name__ == "__main__":
    # batch, label_size, embedding_size, hidden_size
    B, L, E, H = 10, 4, 32, 32

    key = jax.random.PRNGKey(0)
    kx, kg, kw1, kb1, kw2, kb2 = jax.random.split(key, 6)

    x = jax.random.normal(kx, (B, L, E), dtype=jnp.float32)
    global_prototype = jax.random.normal(kg, (L + 1, E), dtype=jnp.float32)
    # torch Linear convention: W[out, in]
    w1 = jax.random.normal(kw1, (H, E), dtype=jnp.float32) * 0.1
    b1 = jax.random.normal(kb1, (H,), dtype=jnp.float32) * 0.1
    w2 = jax.random.normal(kw2, (E, H), dtype=jnp.float32) * 0.1
    b2 = jax.random.normal(kb2, (E,), dtype=jnp.float32) * 0.1

    # batch['label_list'] equivalent: labels present per example.
    # Label 3 is removed from every example -> its prototype row stays zero.
    label_list = [
        [l for l in range(L) if (idx + l) % 3 == 0 and l != 3]
        for idx in range(B)
    ]
    mask = jnp.array(
        [[1.0 if l in labels else 0.0 for l in range(L)] for labels in label_list],
        dtype=jnp.float32)   # [B, L]

    # Hoisted weight preprocessing (done once, outside the per-call path).
    w1t = jnp.transpose(w1)   # [E, H]
    w2t = jnp.transpose(w2)   # [H, E]

    # block_b=4 with B=10 exercises the multi-step pipelined grid + tail mask.
    out = prototype_forward(x, mask, global_prototype, w1t, b1, w2t, b2,
                            block_b=4)
    out = jax.block_until_ready(out)

    ref = _reference_numpy(np.asarray(x), label_list, np.asarray(global_prototype),
                           np.asarray(w1), np.asarray(b1),
                           np.asarray(w2), np.asarray(b2))
    np.testing.assert_allclose(np.asarray(out), ref, rtol=1e-5, atol=1e-5)

    print("KERNEL_OK")
</pallas_src>

<mosaic_0001>
module attributes {stable_mosaic.version = 11 : i64} {
  func.func @_prototype_kernel(%arg0: i32, %arg1: memref<4x4x32xf32, #tpu.memory_space<vmem>>, %arg2: memref<4x4x1xf32, #tpu.memory_space<vmem>>, %arg3: memref<5x32xf32, #tpu.memory_space<vmem>>, %arg4: memref<32x32xf32, #tpu.memory_space<vmem>>, %arg5: memref<1x32xf32, #tpu.memory_space<vmem>>, %arg6: memref<32x32xf32, #tpu.memory_space<vmem>>, %arg7: memref<1x32xf32, #tpu.memory_space<vmem>>, %arg8: memref<5x32xf32, #tpu.memory_space<vmem>>, %arg9: memref<4x32xf32, #tpu.memory_space<vmem>>, %arg10: memref<4x32xf32, #tpu.memory_space<vmem>>, %arg11: memref<4x1xf32, #tpu.memory_space<vmem>>) attributes {dimension_semantics = [#tpu.dimension_semantics<arbitrary>], iteration_bounds = array<i64: 3>, scalar_prefetch = 0 : i64, scratch_operands = 3 : i64, tpu.core_type = #tpu.core_type<tc>, window_params = [{transform_indices = @transform_0, window_bounds = array<i64: 4, 4, 32>}, {transform_indices = @transform_1, window_bounds = array<i64: 4, 4, 1>}, {pipeline_mode = #tpu.pipeline_mode<synchronous>, transform_indices = @transform_2, window_bounds = array<i64: 5, 32>}, {pipeline_mode = #tpu.pipeline_mode<synchronous>, transform_indices = @transform_3, window_bounds = array<i64: 32, 32>}, {pipeline_mode = #tpu.pipeline_mode<synchronous>, transform_indices = @transform_4, window_bounds = array<i64: 1, 32>}, {pipeline_mode = #tpu.pipeline_mode<synchronous>, transform_indices = @transform_5, window_bounds = array<i64: 32, 32>}, {pipeline_mode = #tpu.pipeline_mode<synchronous>, transform_indices = @transform_6, window_bounds = array<i64: 1, 32>}, {pipeline_mode = #tpu.pipeline_mode<synchronous>, transform_indices = @transform_7, window_bounds = array<i64: 5, 32>}]} {
    %c0_i32 = arith.constant 0 : i32
    %0 = arith.cmpi eq, %arg0, %c0_i32 : i32
    %1 = arith.extui %0 : i1 to i32
    %c0_i32_0 = arith.constant 0 : i32
    %2 = arith.cmpi ne, %1, %c0_i32_0 : i32
    scf.if %2 {
      %cst_23 = arith.constant 0.000000e+00 : f32
      %36 = vector.broadcast %cst_23 : f32 to vector<4x32xf32>
      %c0_24 = arith.constant 0 : index
      %c0_25 = arith.constant 0 : index
      %37 = vector.load %arg9[%c0_24, %c0_25] : memref<4x32xf32, #tpu.memory_space<vmem>>, vector<4x32xf32>
      tpu.vector_store %arg9[%c0_24, %c0_25], %36 {strides = array<i32>} : memref<4x32xf32, #tpu.memory_space<vmem>>, vector<4x32xf32>,
      %cst_26 = arith.constant 0.000000e+00 : f32
      %38 = vector.broadcast %cst_26 : f32 to vector<4x32xf32>
      %c0_27 = arith.constant 0 : index
      %c0_28 = arith.constant 0 : index
      %39 = vector.load %arg10[%c0_27, %c0_28] : memref<4x32xf32, #tpu.memory_space<vmem>>, vector<4x32xf32>
      tpu.vector_store %arg10[%c0_27, %c0_28], %38 {strides = array<i32>} : memref<4x32xf32, #tpu.memory_space<vmem>>, vector<4x32xf32>,
      %cst_29 = arith.constant 0.000000e+00 : f32
      %40 = vector.broadcast %cst_29 : f32 to vector<4x1xf32>
      %c0_30 = arith.constant 0 : index
      %c0_31 = arith.constant 0 : index
      %41 = vector.load %arg11[%c0_30, %c0_31] : memref<4x1xf32, #tpu.memory_space<vmem>>, vector<4x1xf32>
      tpu.vector_store %arg11[%c0_30, %c0_31], %40 {strides = array<i32>} : memref<4x1xf32, #tpu.memory_space<vmem>>, vector<4x1xf32>,
    } else {
    }
    %c0 = arith.constant 0 : index
    %c0_1 = arith.constant 0 : index
    %c0_2 = arith.constant 0 : index
    %3 = vector.load %arg1[%c0, %c0_1, %c0_2] : memref<4x4x32xf32, #tpu.memory_space<vmem>>, vector<4x4x32xf32>
    %c0_3 = arith.constant 0 : index
    %c0_4 = arith.constant 0 : index
    %c0_5 = arith.constant 0 : index
    %4 = vector.load %arg2[%c0_3, %c0_4, %c0_5] : memref<4x4x1xf32, #tpu.memory_space<vmem>>, vector<4x4x1xf32>
    %5 = tpu.iota {dimensions = array<i32: 0>} : vector<4x1x1xi32>
    %c4_i32 = arith.constant 4 : i32
    %6 = arith.muli %arg0, %c4_i32 : i32
    %7 = vector.broadcast %6 : i32 to vector<4x1x1xi32>
    %8 = arith.addi %5, %7 : vector<4x1x1xi32>
    %c10_i32 = arith.constant 10 : i32
    %9 = vector.broadcast %c10_i32 : i32 to vector<4x1x1xi32>
    %10 = arith.cmpi slt, %8, %9 : vector<4x1x1xi32>
    %cst = arith.constant 0.000000e+00 : f32
    %11 = vector.shape_cast %10 : vector<4x1x1xi1> to vector<4x1x1xi1>
    %12 = vector.broadcast %11 : vector<4x1x1xi1> to vector<4x4x32xi1>
    %13 = vector.broadcast %cst : f32 to vector<4x4x32xf32>
    %14 = arith.select %12, %3, %13 : vector<4x4x32xi1>, vector<4x4x32xf32>
    %cst_6 = arith.constant 0.000000e+00 : f32
    %15 = vector.shape_cast %10 : vector<4x1x1xi1> to vector<4x1x1xi1>
    %16 = vector.broadcast %15 : vector<4x1x1xi1> to vector<4x4x1xi1>
    %17 = vector.broadcast %cst_6 : f32 to vector<4x4x1xf32>
    %18 = arith.select %16, %4, %17 : vector<4x4x1xi1>, vector<4x4x1xf32>
    %c0_7 = arith.constant 0 : index
    %c0_8 = arith.constant 0 : index
    %19 = vector.load %arg9[%c0_7, %c0_8] : memref<4x32xf32, #tpu.memory_space<vmem>>, vector<4x32xf32>
    %20 = vector.broadcast %18 : vector<4x4x1xf32> to vector<4x4x32xf32>
    %21 = arith.mulf %20, %14 : vector<4x4x32xf32>
    %cst_9 = arith.constant dense<0.000000e+00> : vector<4x32xf32>
    %22 = vector.multi_reduction <add>, %21, %cst_9 [0] : vector<4x4x32xf32> to vector<4x32xf32>
    %23 = arith.addf %19, %22 : vector<4x32xf32>
    %c0_10 = arith.constant 0 : index
    %c0_11 = arith.constant 0 : index
    %24 = vector.load %arg9[%c0_10, %c0_11] : memref<4x32xf32, #tpu.memory_space<vmem>>, vector<4x32xf32>
    tpu.vector_store %arg9[%c0_10, %c0_11], %23 {strides = array<i32>} : memref<4x32xf32, #tpu.memory_space<vmem>>, vector<4x32xf32>,
    %c0_12 = arith.constant 0 : index
    %c0_13 = arith.constant 0 : index
    %25 = vector.load %arg10[%c0_12, %c0_13] : memref<4x32xf32, #tpu.memory_space<vmem>>, vector<4x32xf32>
    %cst_14 = arith.constant dense<0.000000e+00> : vector<4x32xf32>
    %26 = vector.multi_reduction <add>, %14, %cst_14 [0] : vector<4x4x32xf32> to vector<4x32xf32>
    %27 = arith.addf %25, %26 : vector<4x32xf32>
    %c0_15 = arith.constant 0 : index
    %c0_16 = arith.constant 0 : index
    %28 = vector.load %arg10[%c0_15, %c0_16] : memref<4x32xf32, #tpu.memory_space<vmem>>, vector<4x32xf32>
    tpu.vector_store %arg10[%c0_15, %c0_16], %27 {strides = array<i32>} : memref<4x32xf32, #tpu.memory_space<vmem>>, vector<4x32xf32>,
    %c0_17 = arith.constant 0 : index
    %c0_18 = arith.constant 0 : index
    %29 = vector.load %arg11[%c0_17, %c0_18] : memref<4x1xf32, #tpu.memory_space<vmem>>, vector<4x1xf32>
    %cst_19 = arith.constant dense<0.000000e+00> : vector<4x1xf32>
    %30 = vector.multi_reduction <add>, %18, %cst_19 [0] : vector<4x4x1xf32> to vector<4x1xf32>
    %31 = arith.addf %29, %30 : vector<4x1xf32>
    %c0_20 = arith.constant 0 : index
    %c0_21 = arith.constant 0 : index
    %32 = vector.load %arg11[%c0_20, %c0_21] : memref<4x1xf32, #tpu.memory_space<vmem>>, vector<4x1xf32>
    tpu.vector_store %arg11[%c0_20, %c0_21], %31 {strides = array<i32>} : memref<4x1xf32, #tpu.memory_space<vmem>>, vector<4x1xf32>,
    %c2_i32 = arith.constant 2 : i32
    %33 = arith.cmpi eq, %arg0, %c2_i32 : i32
    %34 = arith.extui %33 : i1 to i32
    %c0_i32_22 = arith.constant 0 : i32
    %35 = arith.cmpi ne, %34, %c0_i32_22 : i32
    scf.if %35 {
      %c0_23 = arith.constant 0 : index
      %c0_24 = arith.constant 0 : index
      %36 = vector.load %arg9[%c0_23, %c0_24] : memref<4x32xf32, #tpu.memory_space<vmem>>, vector<4x32xf32>
      %c0_25 = arith.constant 0 : index
      %c0_26 = arith.constant 0 : index
      %37 = vector.load %arg10[%c0_25, %c0_26] : memref<4x32xf32, #tpu.memory_space<vmem>>, vector<4x32xf32>
      %c0_27 = arith.constant 0 : index
      %c0_28 = arith.constant 0 : index
      %38 = vector.load %arg11[%c0_27, %c0_28] : memref<4x1xf32, #tpu.memory_space<vmem>>, vector<4x1xf32>
      %39 = arith.subf %37, %36 : vector<4x32xf32>
      %cst_29 = arith.constant 1.000000e+01 : f32
      %40 = vector.broadcast %cst_29 : f32 to vector<4x1xf32>
      %41 = arith.subf %40, %38 : vector<4x1xf32>
      %cst_30 = arith.constant 1.000000e+00 : f32
      %42 = vector.broadcast %cst_30 : f32 to vector<4x1xf32>
      %43 = arith.maximumf %38, %42 : vector<4x1xf32>
      %44 = vector.broadcast %43 : vector<4x1xf32> to vector<4x32xf32>
      %45 = arith.divf %36, %44 : vector<4x32xf32>
      %cst_31 = arith.constant 1.000000e+00 : f32
      %46 = vector.broadcast %cst_31 : f32 to vector<4x1xf32>
      %47 = arith.maximumf %41, %46 : vector<4x1xf32>
      %48 = vector.broadcast %47 : vector<4x1xf32> to vector<4x32xf32>
      %49 = arith.divf %39, %48 : vector<4x32xf32>
      %c0_32 = arith.constant 0 : index
      %c0_33 = arith.constant 0 : index
      %50 = vector.load %arg3[%c0_32, %c0_33] : memref<5x32xf32, #tpu.memory_space<vmem>>, vector<5x32xf32>
      %51 = vector.extract_strided_slice %50 {offsets = [0, 0], sizes = [4, 32], strides = [1, 1]} : vector<5x32xf32> to vector<4x32xf32>
      %52 = vector.extract_strided_slice %50 {offsets = [4, 0], sizes = [1, 32], strides = [1, 1]} : vector<5x32xf32> to vector<1x32xf32>
      %cst_34 = arith.constant 5.000000e-01 : f32
      %53 = vector.broadcast %cst_34 : f32 to vector<4x32xf32>
      %54 = arith.mulf %53, %45 : vector<4x32xf32>
      %cst_35 = arith.constant 5.000000e-01 : f32
      %55 = vector.broadcast %cst_35 : f32 to vector<4x32xf32>
      %56 = arith.mulf %55, %51 : vector<4x32xf32>
      %57 = arith.addf %54, %56 : vector<4x32xf32>
      %cst_36 = arith.constant 5.000000e-01 : f32
      %58 = vector.broadcast %cst_36 : f32 to vector<4x32xf32>
      %59 = arith.mulf %58, %49 : vector<4x32xf32>
      %cst_37 = arith.constant 5.000000e-01 : f32
      %60 = vector.broadcast %cst_37 : f32 to vector<1x32xf32>
      %61 = arith.mulf %60, %52 : vector<1x32xf32>
      %62 = vector.broadcast %61 : vector<1x32xf32> to vector<4x32xf32>
      %63 = arith.addf %59, %62 : vector<4x32xf32>
      %c0_38 = arith.constant 0 : index
      %c0_39 = arith.constant 0 : index
      %64 = vector.load %arg4[%c0_38, %c0_39] : memref<32x32xf32, #tpu.memory_space<vmem>>, vector<32x32xf32>
      %c0_40 = arith.constant 0 : index
      %c0_41 = arith.constant 0 : index
      %65 = vector.load %arg5[%c0_40, %c0_41] : memref<1x32xf32, #tpu.memory_space<vmem>>, vector<1x32xf32>
      %c0_42 = arith.constant 0 : index
      %c0_43 = arith.constant 0 : index
      %66 = vector.load %arg6[%c0_42, %c0_43] : memref<32x32xf32, #tpu.memory_space<vmem>>, vector<32x32xf32>
      %c0_44 = arith.constant 0 : index
      %c0_45 = arith.constant 0 : index
      %67 = vector.load %arg7[%c0_44, %c0_45] : memref<1x32xf32, #tpu.memory_space<vmem>>, vector<1x32xf32>
      %68 = tpu.concatenate %57, %63 in 0 : vector<4x32xf32>, vector<4x32xf32> -> vector<8x32xf32>
      %cst_46 = arith.constant dense<0.000000e+00> : vector<8x32xf32>
      %69 = tpu.matmul %68, %64, %cst_46 {dimension_numbers = #tpu.dot_dimension_numbers<[1], [0], [0], [1], [0, 0, 1, 1], [], []>} : vector<8x32xf32>, vector<32x32xf32>, vector<8x32xf32> -> vector<8x32xf32>
      %70 = vector.broadcast %65 : vector<1x32xf32> to vector<8x32xf32>
      %71 = arith.addf %69, %70 : vector<8x32xf32>
      %cst_47 = arith.constant 0.000000e+00 : f32
      %72 = vector.broadcast %cst_47 : f32 to vector<8x32xf32>
      %73 = arith.maximumf %71, %72 : vector<8x32xf32>
      %cst_48 = arith.constant dense<0.000000e+00> : vector<8x32xf32>
      %74 = tpu.matmul %73, %66, %cst_48 {dimension_numbers = #tpu.dot_dimension_numbers<[1], [0], [0], [1], [0, 0, 1, 1], [], []>} : vector<8x32xf32>, vector<32x32xf32>, vector<8x32xf32> -> vector<8x32xf32>
      %75 = vector.broadcast %67 : vector<1x32xf32> to vector<8x32xf32>
      %76 = arith.addf %74, %75 : vector<8x32xf32>
      %77 = vector.extract_strided_slice %76 {offsets = [0, 0], sizes = [4, 32], strides = [1, 1]} : vector<8x32xf32> to vector<4x32xf32>
      %78 = vector.extract_strided_slice %76 {offsets = [4, 0], sizes = [4, 32], strides = [1, 1]} : vector<8x32xf32> to vector<4x32xf32>
      %cst_49 = arith.constant 0.000000e+00 : f32
      %79 = vector.broadcast %cst_49 : f32 to vector<4x1xf32>
      %80 = arith.cmpf ogt, %38, %79 : vector<4x1xf32>
      %cst_50 = arith.constant 0.000000e+00 : f32
      %81 = vector.shape_cast %80 : vector<4x1xi1> to vector<4x1xi1>
      %82 = vector.broadcast %81 : vector<4x1xi1> to vector<4x32xi1>
      %83 = vector.broadcast %cst_50 : f32 to vector<4x32xf32>
      %84 = arith.select %82, %77, %83 : vector<4x32xi1>, vector<4x32xf32>
      %cst_51 = arith.constant 0.000000e+00 : f32
      %85 = vector.broadcast %cst_51 : f32 to vector<4x1xf32>
      %86 = arith.cmpf ogt, %41, %85 : vector<4x1xf32>
      %87 = arith.extui %86 : vector<4x1xi1> to vector<4x1xi32>
      %88 = arith.sitofp %87 : vector<4x1xi32> to vector<4x1xf32>
      %cst_52 = arith.constant dense<0.000000e+00> : vector<1xf32>
      %89 = vector.multi_reduction <add>, %88, %cst_52 [0] : vector<4x1xf32> to vector<1xf32>
      %90 = vector.shape_cast %89 : vector<1xf32> to vector<1x1xf32>
      %91 = vector.broadcast %88 : vector<4x1xf32> to vector<4x32xf32>
      %92 = arith.mulf %78, %91 : vector<4x32xf32>
      %cst_53 = arith.constant dense<0.000000e+00> : vector<32xf32>
      %93 = vector.multi_reduction <add>, %92, %cst_53 [0] : vector<4x32xf32> to vector<32xf32>
      %94 = vector.shape_cast %93 : vector<32xf32> to vector<1x32xf32>
      %cst_54 = arith.constant 1.000000e+00 : f32
      %95 = vector.broadcast %cst_54 : f32 to vector<1x1xf32>
      %96 = arith.maximumf %90, %95 : vector<1x1xf32>
      %97 = vector.broadcast %96 : vector<1x1xf32> to vector<1x32xf32>
      %98 = arith.divf %94, %97 : vector<1x32xf32>
      %c0_55 = arith.constant 0 : index
      %c0_56 = arith.constant 0 : index
      %99 = vector.load %arg8[%c0_55, %c0_56] : memref<5x32xf32, #tpu.memory_space<vmem>>, vector<4x32xf32>
      tpu.vector_store %arg8[%c0_55, %c0_56], %84 {strides = array<i32>} : memref<5x32xf32, #tpu.memory_space<vmem>>, vector<4x32xf32>,
      %c4 = arith.constant 4 : index
      %c0_57 = arith.constant 0 : index
      %100 = vector.load %arg8[%c4, %c0_57] : memref<5x32xf32, #tpu.memory_space<vmem>>, vector<1x32xf32>
      tpu.vector_store %arg8[%c4, %c0_57], %98 {strides = array<i32>} : memref<5x32xf32, #tpu.memory_space<vmem>>, vector<1x32xf32>,
    } else {
    }
    return
  }
  func.func @transform_0(%arg0: i32) -> (i32, i32, i32) {
    %c0_i32 = arith.constant 0 : i32
    %c0_i32_0 = arith.constant 0 : i32
    %c0_i32_1 = arith.constant 0 : i32
    return %arg0, %c0_i32, %c0_i32_0 : i32, i32, i32
  }
  func.func @transform_1(%arg0: i32) -> (i32, i32, i32) {
    %c0_i32 = arith.constant 0 : i32
    %c0_i32_0 = arith.constant 0 : i32
    %c0_i32_1 = arith.constant 0 : i32
    return %arg0, %c0_i32, %c0_i32_0 : i32, i32, i32
  }
  func.func @transform_2(%arg0: i32) -> (i32, i32) {
    %c0_i32 = arith.constant 0 : i32
    %c0_i32_0 = arith.constant 0 : i32
    %c0_i32_1 = arith.constant 0 : i32
    return %c0_i32, %c0_i32_0 : i32, i32
  }
  func.func @transform_3(%arg0: i32) -> (i32, i32) {
    %c0_i32 = arith.constant 0 : i32
    %c0_i32_0 = arith.constant 0 : i32
    %c0_i32_1 = arith.constant 0 : i32
    return %c0_i32, %c0_i32_0 : i32, i32
  }
  func.func @transform_4(%arg0: i32) -> (i32, i32) {
    %c0_i32 = arith.constant 0 : i32
    %c0_i32_0 = arith.constant 0 : i32
    %c0_i32_1 = arith.constant 0 : i32
    return %c0_i32, %c0_i32_0 : i32, i32
  }
  func.func @transform_5(%arg0: i32) -> (i32, i32) {
    %c0_i32 = arith.constant 0 : i32
    %c0_i32_0 = arith.constant 0 : i32
    %c0_i32_1 = arith.constant 0 : i32
    return %c0_i32, %c0_i32_0 : i32, i32
  }
  func.func @transform_6(%arg0: i32) -> (i32, i32) {
    %c0_i32 = arith.constant 0 : i32
    %c0_i32_0 = arith.constant 0 : i32
    %c0_i32_1 = arith.constant 0 : i32
    return %c0_i32, %c0_i32_0 : i32, i32
  }
  func.func @transform_7(%arg0: i32) -> (i32, i32) {
    %c0_i32 = arith.constant 0 : i32
    %c0_i32_0 = arith.constant 0 : i32
    %c0_i32_1 = arith.constant 0 : i32
    return %c0_i32, %c0_i32_0 : i32, i32
  }
}

</mosaic_0001>

<bundles_post_ra>
// kernel: tpu_custom_call.1
= control target key start
LH: loop header
LB: loop body
LE: loop exit
PB: predicated region body
PF: predicated region fallthrough
CT: control target
= control target key end

     0   :  { %12 = vsyncpa [#allocation6], 0  ;;  %s1234_s0 = inlined_call_operand.vmem [shape: f32[10,4,32], index: 0, kind: input, shape index: {}]   ;;  %s1235_s1 = inlined_call_operand.vmem [shape: f32[10,4,1], index: 1, kind: input, shape index: {}]   ;;  %s1236_s2 = inlined_call_operand.vmem [shape: f32[5,32], index: 2, kind: input, shape index: {}]   ;;  %s1237_s3 = inlined_call_operand.hbm [shape: f32[32,32], index: 3, kind: input, shape index: {}]   ;;  %s1238_s4 = inlined_call_operand.vmem [shape: f32[1,32], index: 4, kind: input, shape index: {}]   ;;  %s1239_s5 = inlined_call_operand.hbm [shape: f32[32,32], index: 5, kind: input, shape index: {}]   ;;  %s1240_s6 = inlined_call_operand.vmem [shape: f32[1,32], index: 6, kind: input, shape index: {}]   ;;  %s1241_s7 = inlined_call_operand.hbm [shape: f32[5,32], index: 7, kind: output, shape index: {}]  }
   0x1   :  { %13 = vsyncpa [#allocation9], 0 }
   0x2   :  { %14 = vsyncpa [#allocation7], 0  ;;  %s1067_s24 = smov 0  }
   0x3 LB: > { %s1073_s25 = sadd.s32 4294967295, %s1014_s24   ;;  %p793_p0 = scmp.ge.s32.totalorder %s1014_s24, 1  ;;  %s1014_s24 = sphi %s1067_s24, %s20_s24  }
   0x4   : > { %p203_p1 = scmp.lt.s32.totalorder %s1014_s24, 4  ;;  %s1016_s26 = smov [#allocation5]  }
   0x5   : > { %s218_s27 = sshll.u32 %s1016_s26, 4  ;;  %p1242_p4 = scmp.eq.s32.totalorder %s1073_s25, 0  ;;  %s219_s27 = int_to_ptr.vmem [resolvable:$true] %s218_s27 }
   0x6   : > { %p1078_p3 = pnand %p793_p0, %p203_p1  ;;  %s1017_s29 = smov [#allocation8]  }
   0x7   : > { %s234_s30 = sshll.u32 %s1017_s29, 4  ;;  %s914_s11 = scalar_lea.hbm %s1237_s3, 512  ;;  %s1091_s30 = int_to_ptr.vmem [resolvable:$true] %s234_s30 }
   0x8   : > { %s1244_s28 = scalar_select %p1078_p3, 1, 0 }
   0x9   : > { %p872_p5 = pneg %p1078_p3  ;;  %p915_p7 = scmp.ne.s32.totalorder %s1237_s3, %s914_s11 }
   0xa   : > { %p921_p11 = scmp.lt.u32.totalorder %s914_s11, %s1237_s3 }
   0xb   : > { %p1087_p6 = pnand %p1242_p4, %p872_p5 }
   0xd   : > { %p916_p8 = pneg %p1087_p6 }
   0xf   : > { %p917_p9 = pnand %p916_p8, %p915_p7 }
  0x11   : > { %p918_p10 = pneg %p917_p9 }
  0x13   : > { %p923_p12 = pnand %p921_p11, %p918_p10 }
  0x15   : > { %926 = shalt.err (!%p923_p12)
}
  0x16   : > { %s927_s16 = scalar_lea.vmem %s219_s27, 512  ;;  %p935_p5 = scmp.lt.s32.totalorder %s219_s27, %s219_s27 }
  0x17   : > { %p928_p13 = scmp.ne.s32.totalorder %s219_s27, %s927_s16  ;;  %p936_p2 = scmp.lt.s32.totalorder %s927_s16, %s927_s16 }
  0x19   : > { %p930_p0 = pnand %p928_p13, %p916_p8  ;;  %p937_p4 = por %p936_p2, %p935_p5 }
  0x1b   : > { %p931_p1 = pneg %p930_p0 }
  0x1d   : > { %p938_p3 = pnand %p937_p4, %p931_p1 }
  0x1f   : > { %941 = shalt.err (!%p938_p3)
}
  0x20   : > { %s1018_s17 = smov 128   ;;  %s1019_s18 = smov 8  }
  0x21   : > { %875 = dma.hbm_to_vmem [thread:$0]  (!%p1087_p6), %s1237_s3, 512, %s219_s27, [#allocation6], %s1018_s17, %s1018_s17, %s1019_s18  }
  0x22   : > { %s942_s23 = scalar_lea.hbm %s1239_s5, 512 }
  0x23   : > { %p943_p7 = scmp.ne.s32.totalorder %s1239_s5, %s942_s23  ;;  %p949_p4 = scmp.lt.u32.totalorder %s942_s23, %s1239_s5 }
  0x25   : > { %p945_p2 = pnand %p943_p7, %p916_p8 }
  0x27   : > { %p946_p3 = pneg %p945_p2 }
  0x29   : > { %p951_p9 = pnand %p949_p4, %p946_p3 }
  0x2b   : > { %954 = shalt.err (!%p951_p9)
}
  0x2c   : > { %s955_s27 = scalar_lea.vmem %s1091_s30, 512  ;;  %p963_p13 = scmp.lt.s32.totalorder %s1091_s30, %s1091_s30 }
  0x2d   : > { %p956_p10 = scmp.ne.s32.totalorder %s1091_s30, %s955_s27  ;;  %p964_p0 = scmp.lt.s32.totalorder %s955_s27, %s955_s27 }
  0x2f   : > { %p958_p11 = pnand %p956_p10, %p916_p8  ;;  %p965_p1 = por %p964_p0, %p963_p13 }
  0x31   : > { %p959_p12 = pneg %p958_p11 }
  0x33   : > { %p966_p5 = pnand %p965_p1, %p959_p12 }
  0x35   : > { %969 = shalt.err (!%p966_p5)
}
  0x36   : > { %878 = dma.hbm_to_vmem [thread:$0]  (!%p1087_p6), %s1239_s5, 512, %s1091_s30, [#allocation9], %s1018_s17, %s1018_s17, %s1019_s18  }
  0x37   : > { %p1246_p7 = scmp.ne.s32.totalorder %s1244_s28, 0 }
  0x38   : > { %p1247_p2 = scmp.eq.s32.totalorder (!%p1246_p7), %s1073_s25, 0 }
  0x39   : > { %287 = sbr.rel (%p1246_p7) target bundleno = 728 (0x2d8), region = 48 }
  0x40   : > { %1001 = dma.done.wait (%p1247_p2), [#allocation6], 512   ;;  %p1248_p8 = pmov %p1247_p2 }
  0x41   : > { %p1249_p3 = pmov %p1247_p2 }
  0x42   : > { %1003 = vsyncadd (%p1248_p8), [#allocation6], 4294966784 }
  0x43   : > { %1005 = dma.done.wait (%p1249_p3), [#allocation9], 512   ;;  %p1250_p4 = pmov %p1247_p2 }
  0x44   : > { %s800_s8 = sshll.u32 %s1073_s25, 2  ;;  %p1251_p6 = scmp.ne.s32.totalorder %s1073_s25, 0 }
  0x45   : > { %1007 = vsyncadd (%p1250_p4), [#allocation9], 4294966784  ;;  %p336_p9 = scmp.lt.s32.totalorder %s800_s8, 9  ;;  %vm363_vm0 = vcmask (!%p1251_p6), 257024   ;;  %vm366_vm1 = vcmask (!%p1251_p6), 3072   ;;  %v1020_v0 = vmov (!%p1251_p6), 0.0  }
  0x46   : > { %362 = sbr.rel (%p1251_p6) target bundleno = 77 (0x4d), region = 60  ;;  %364 = vst.msk [vmem:[#allocation2] sm:$0xf] (!%p1251_p6), %vm363_vm0, %v1020_v0  ;;  %365 = vst.msk [vmem:[#allocation3] sm:$0xf] (!%p1251_p6), %vm363_vm0, %v1020_v0 }
  0x47   : > { %s337_s13 = scalar_select %p336_p9, %s800_s8, 9 }
  0x48   : > { %367 = vst.msk [vmem:[#allocation4] sm:$0xf] (!%p1251_p6), %vm366_vm1, %v1020_v0 }
  0x49   : > { %s801_s30 = sshll.u32 %s337_s13, 2 }
  0x4a   : > { %s1154_s15 = scalar_lea.vmem %s1234_s0, %s801_s30  ;;  %s353_s18 = scalar_lea.vmem %s1235_s1, %s801_s30 }
  0x4d PF: > { %v372_v1 = vld [vmem:[%s353_s18] sm:$0xf]  ;;  %v377_v2 = vstv %s800_s8  ;;  %vm447_vm2 = vcmask 3072   ;;  %v374_v3 = vld [vmem:[%s353_s18 + $0x8] sm:$0xf]  ;;  %v1021_v4 = vmov 0  }
  0x4e   : > { %904 = vset.pattern.permute.xlu0 %v1021_v4  ;;  %vm381_vm3 = vcmp.lt.s32.totalorder %v377_v2, 10  ;;  %905 = vset.pattern.permute.xlu1 %v1021_v4  ;;  %v379_v5 = vadd.s32 2, %v377_v2  ;;  %v373_v6 = vld [vmem:[%s353_s18 + $0x4] sm:$0xf]  ;;  %v378_v7 = vadd.s32 1, %v377_v2  ;;  %v380_v8 = vadd.s32 3, %v377_v2 }
  0x4f   : > { %v397_v9 = vsel %vm381_vm3, %v372_v1, 0.0  ;;  %v375_v10 = vld [vmem:[%s353_s18 + $0xc] sm:$0xf]  ;;  %v368_v12 = vld [vmem:[%s1154_s15] sm:$0xf]  ;;  %vm426_vm7 = vcmask 257024  }
  0x50   : > { %404 = vperm.xlu0 %904, %v397_v9   ;;  %v448_v11 = vsel %vm447_vm2, %v397_v9, 0.0  ;;  %vm383_vm4 = vcmp.lt.s32.totalorder %v379_v5, 10  ;;  %vm382_vm5 = vcmp.lt.s32.totalorder %v378_v7, 10  ;;  %vm384_vm6 = vcmp.lt.s32.totalorder %v380_v8, 10  ;;  %v370_v17 = vld [vmem:[%s1154_s15 + $0x8] sm:$0xf] }
  0x51   : > { %v399_v13 = vsel %vm383_vm4, %v374_v3, 0.0  ;;  %v398_v14 = vsel %vm382_vm5, %v373_v6, 0.0  ;;  %v400_v19 = vsel %vm384_vm6, %v375_v10, 0.0  ;;  %v393_v20 = vsel %vm381_vm3, %v368_v12, 0.0  ;;  %v369_v21 = vld [vmem:[%s1154_s15 + $0x4] sm:$0xf] }
  0x52   : > { %414 = vperm.xlu1 %905, %v399_v13   ;;  %v451_v15 = vsel %vm447_vm2, %v399_v13, 0.0  ;;  %v449_v16 = vsel %vm447_vm2, %v398_v14, 0.0  ;;  %v453_v22 = vsel %vm447_vm2, %v400_v19, 0.0  ;;  %v437_v23 = vsel %vm426_vm7, %v393_v20, 0.0  ;;  %v446_v27 = vld [vmem:[#allocation4] sm:$0xf] }
  0x53   : > { %v450_v18 = vadd.f32 %v449_v16, %v448_v11  ;;  %v395_v25 = vsel %vm383_vm4, %v370_v17, 0.0  ;;  %v394_v26 = vsel %vm382_vm5, %v369_v21, 0.0  ;;  %v371_v30 = vld [vmem:[%s1154_s15 + $0xc] sm:$0xf]  ;;  %v436_v36 = vld [vmem:[#allocation3] sm:$0xf] }
  0x54   : > { %409 = vperm.xlu0 %904, %v398_v14   ;;  %v440_v28 = vsel %vm426_vm7, %v395_v25, 0.0  ;;  %v438_v29 = vsel %vm426_vm7, %v394_v26, 0.0  ;;  %v396_v34 = vsel %vm384_vm6, %v371_v30, 0.0  ;;  %v401_v53 = vld [vmem:[#allocation2] sm:$0xf]  ;;  %p806_p10 = scmp.ne.s32.totalorder %s1073_s25, 2 }
  0x55   : > { %v452_v24 = vadd.f32 %v451_v15, %v450_v18  ;;  %v439_v32 = vadd.f32 %v438_v29, %v437_v23  ;;  %v442_v37 = vsel %vm426_vm7, %v396_v34, 0.0  ;;  %v1022_v58 = vmov (!%p806_p10), 0   ;;  %v492_v63 = vld [vmem:[#allocation5] sm:$0xff] (!%p806_p10)  ;;  %v493_v0 = vld [vmem:[#allocation5 + $0x8] sm:$0xff] (!%p806_p10)  ;;  %v494_v1 = vld [vmem:[#allocation5 + $0x10] sm:$0xff] (!%p806_p10) }
  0x56   : > { %419 = vperm.xlu1 %905, %v400_v19   ;;  %v1023_v2 = vmov (!%p806_p10), 0.0|0.0   ;;  %v849_v3 = vpack.c.bf16 (!%p806_p10), %v493_v0, %v492_v63  ;;  %v495_v4 = vld [vmem:[#allocation5 + $0x18] sm:$0xff] (!%p806_p10)  ;;  %vm1024_vm9 = vmmov (!%p806_p10), 0   ;;  %v1025_v5 = vmov (!%p806_p10), 0.0   ;;  %v497_v7 = vld [vmem:[#allocation8] sm:$0xff] (!%p806_p10)  ;;  %v498_v8 = vld [vmem:[#allocation8 + $0x8] sm:$0xff] (!%p806_p10) }
  0x57   : > { %v454_v31 = vadd.f32 %v453_v22, %v452_v24  ;;  %v441_v35 = vadd.f32 %v440_v28, %v439_v32  ;;  %848 = vmatprep.subr.bf16.mxu0 (!%p806_p10), %v1023_v2  ;;  %834 = vmatprep.mubr.msk.f32.mxu0 (!%p806_p10), %vm1024_vm9, %v1025_v5  ;;  %v852_v6 = vpack.c.bf16 (!%p806_p10), %v495_v4, %v494_v1  ;;  %v487_v11 = vlaneseq (!%p806_p10)  ;;  %v482_v16 = vld [vmem:[%s1236_s2] sm:$0x1f] (!%p806_p10) }
  0x58   : > { %906 = vset.pattern.permute.xlu0 (!%p806_p10), %v1022_v58  ;;  %854 = vmatprep.subr.bf16.mxu1 (!%p806_p10), %v1023_v2  ;;  %v855_v9 = vpack.c.bf16 (!%p806_p10), %v498_v8, %v497_v7  ;;  %v484_v18 = vmul.f32 (!%p806_p10), 0.5, %v482_v16  ;;  %vm505_vm10 = vcmask (!%p806_p10), 1043456   ;;  %vm513_vm11 = vcmask (!%p806_p10), 261120   ;;  %v500_v32 = vld [vmem:[#allocation8 + $0x18] sm:$0xff] (!%p806_p10) }
  0x59   : > { %v455_v33 = vadd.f32 %v454_v31, %v446_v27  ;;  %v443_v38 = vadd.f32 %v442_v37, %v441_v35  ;;  %845 = vmatprep.mubr.msk.f32.mxu1 (!%p806_p10), %vm1024_vm9, %v1025_v5  ;;  %850 = vmatpush3.bf16.msra.mxu0 (!%p806_p10), %v849_v3  ;;  %v488_v13 = vshrl.u32 (!%p806_p10), %v487_v11, 7  ;;  %v499_v31 = vld [vmem:[#allocation8 + $0x10] sm:$0xff] (!%p806_p10)  ;;  %vm710_vm14 = vcmask (!%p806_p10), 253952  }
  0x5a   : > { %907 = vset.pattern.permute.xlu1 (!%p806_p10), %v1022_v58  ;;  %851 = vmatprep.subr.bf16.mxu0 (!%p806_p10), %v1023_v2 }
  0x5b   : > { %456 = vst.msk [vmem:[#allocation4] sm:$0xf] %vm447_vm2, %v455_v33  ;;  %v444_v39 = vadd.f32 %v443_v38, %v436_v36  ;;  %856 = vmatpush3.bf16.msra.mxu1 (!%p806_p10), %v855_v9  ;;  %v489_v19 = vsub.s32 (!%p806_p10), 4, %v488_v13  ;;  %v858_v33 = vpack.c.bf16 (!%p806_p10), %v500_v32, %v499_v31 }
  0x5c   : > { %857 = vmatprep.subr.bf16.mxu1 (!%p806_p10), %v1023_v2 }
  0x5d   : > { %445 = vst.msk [vmem:[#allocation3] sm:$0xf] %vm426_vm7, %v444_v39  ;;  %853 = vmatpush3.bf16.msra.mxu0 (!%p806_p10), %v852_v6  ;;  %v490_v22 = vrot.slane (!%p806_p10), %v484_v18, %v489_v19 }
  0x5f   : > { %859 = vmatpush3.bf16.msra.mxu1 (!%p806_p10), %v858_v33 }
  0x62   : > { %v1189_v57 = vld [vmem:[#allocation4] sm:$0xf] (!%p806_p10) }
  0x63   : > { %v465_v59 = vsub.f32 (!%p806_p10), 10.0, %v1189_v57  ;;  %v466_v61 = vmax.f32 (!%p806_p10), %v1189_v57, 1.0  ;;  %vm667_vm8 = vcmp.gt.f32.partialorder (!%p806_p10), %v1189_v57, 0.0 }
  0x64   : > { %v668_v62 = vsel (!%p806_p10), %vm667_vm8, 1, %v1022_v58  ;;  %v462_v15 = vld [vmem:[#allocation3] sm:$0xf] (!%p806_p10) }
  0x65   : > { %v474_v60 = vmax.f32 (!%p806_p10), %v465_v59, 1.0  ;;  %vm674_vm12 = vcmp.gt.f32.partialorder (!%p806_p10), %v465_v59, 0.0 }
  0x67   : > { %477 = vperm.xlu0 (!%p806_p10), %906, %v474_v60  }
  0x6b   : > { %469 = vperm.xlu0 (!%p806_p10), %906, %v466_v61  }
  0x6f   : > { %670 = vperm.xlu0 (!%p806_p10), %906, %v668_v62  }
  0xcf   : > { %v405_v40 = vpop.permute.xlu0 %404 }
  0xd0   : > { %v422_v42 = vmul.f32 %v405_v40, %v393_v20 }
  0xd1   : > { %v415_v41 = vpop.permute.xlu1 %414 }
  0xd2   : > { %v424_v44 = vmul.f32 %v415_v41, %v395_v25  ;;  %v427_v47 = vsel %vm426_vm7, %v422_v42, 0.0 }
  0xd3   : > { %v410_v43 = vpop.permute.xlu0 %409 }
  0xd4   : > { %v423_v45 = vmul.f32 %v410_v43, %v394_v26  ;;  %v430_v51 = vsel %vm426_vm7, %v424_v44, 0.0  ;;  %v807_v43 = vld [vmem:[%s1238_s4] ss:$0 sm:$0xff] (!%p806_p10) }
  0xd5   : > { %v420_v46 = vpop.permute.xlu1 %419 }
  0xd6   : > { %v428_v48 = vsel %vm426_vm7, %v423_v45, 0.0  ;;  %v425_v49 = vmul.f32 %v420_v46, %v396_v34  ;;  %v811_v34 = vsel (!%p806_p10), %vm674_vm12, 1.0, %v1025_v5 }
  0xd7   : > { %v429_v50 = vadd.f32 %v428_v48, %v427_v47  ;;  %686 = vperm.xlu1 (!%p806_p10), %907, %v811_v34   ;;  %v677_v35 = vsel (!%p806_p10), %vm447_vm2, %v811_v34, 0.0 }
  0xd8   : > { %v432_v54 = vsel %vm426_vm7, %v425_v49, 0.0  ;;  %v678_v36 = vrot.slane (!%p806_p10), %v677_v35, 4  ;;  %v809_v49 = vld [vmem:[%s1240_s6] ss:$0 sm:$0xff] (!%p806_p10) }
  0xd9   : > { %v431_v52 = vadd.f32 %v430_v51, %v429_v50  ;;  %460 = sbr.rel (%p806_p10) target bundleno = 703 (0x2bf), region = 64 }
  0xda   : > { %v679_v37 = vadd.f32 (!%p806_p10), %v678_v36, %v677_v35 }
  0xdb   : > { %v433_v55 = vadd.f32 %v432_v54, %v431_v52 }
  0xdc   : > { %v680_v38 = vrot.slane (!%p806_p10), %v679_v37, 2 }
  0xdd   : > { %v434_v56 = vadd.f32 %v433_v55, %v401_v53 }
  0xde   : > { %v681_v39 = vadd.f32 (!%p806_p10), %v680_v38, %v679_v37 }
  0xdf   : > { %435 = vst.msk [vmem:[#allocation2] sm:$0xf] %vm426_vm7, %v434_v56 }
  0xe0   : > { %v682_v40 = vrot.slane %v681_v39, 1 }
  0xe2   : > { %v683_v41 = vadd.f32 %v682_v40, %v681_v39 }
  0xe4   : > { %v701_v42 = vmax.f32 %v683_v41, 1.0 }
  0xe6   : > { %v478_v10 = vpop.permute.xlu0 %477  ;;  %v461_v14 = vld [vmem:[#allocation2] sm:$0xf]  ;;  %704 = vperm.xlu1 %907, %v701_v42  }
  0xe7   : > { %908 = vrcp.f32 %v478_v10  ;;  %v464_v17 = vsub.f32 %v462_v15, %v461_v14 }
  0xea   : > { %v470_v12 = vpop.permute.xlu0 %469 }
  0xeb   : > { %910 = vrcp.f32 %v470_v12 }
  0xee   : > { %v671_v50 = vpop.permute.xlu0 %670 }
  0xef   : > { %vm672_vm13 = vcmp.eq.s32.totalorder %v671_v50, 1 }
  0xf1   : > { %v909_v20 = vpop.eup %908 }
  0xf2   : > { %v481_v21 = vmul.f32 %v909_v20, %v464_v17 }
  0xf4   : > { %v486_v23 = vmul.f32 0.5, %v481_v21 }
  0xf5   : > { %v911_v24 = vpop.eup %910 }
  0xf6   : > { %v473_v25 = vmul.f32 %v911_v24, %v461_v14  ;;  %v491_v26 = vadd.f32 %v490_v22, %v486_v23 }
  0xf8   : > { %v483_v27 = vmul.f32 0.5, %v473_v25  ;;  %v503_v29 = vrot.slane %v491_v26, 4 }
  0xfa   : > { %v485_v28 = vadd.f32 %v484_v18, %v483_v27 }
  0xfc   : > { %v506_v30 = vsel %vm505_vm10, %v485_v28, %v503_v29 }
  0xfd   : > { %835 = vmatmul.mubr.msk.f32.vlgmr.msra.gmra.mrb[0].mxu0 %vm513_vm11, %v506_v30 }
 0x156   : > { %v687_v48 = vpop.permute.xlu1 %686 }
 0x157   : > { %v688_v51 = vrot.slane %v687_v48, 4 }
 0x165   : > { %v705_v58 = vpop.permute.xlu1 %704 }
 0x166   : > { %912 = vrcp.f32 %v705_v58 }
 0x170   : > { %v913_v2 = vpop.eup %912 }
 0x1d0   : > { %v583_v44 = vpop.f32.mrb[0].mxu0 }
 0x1d1   : > { %v584_v45 = vadd.f32 %v807_v43, %v583_v44  ;;  %v836_v46 = vpop.f32.mrb[1].mxu0 }
 0x1d3   : > { %v587_v47 = vmax.f32 %v584_v45, 0.0 }
 0x1d5   : > { %846 = vmatmul.mubr.msk.f32.vlgmr.msra.gmra.mrb[0].mxu1 %vm513_vm11, %v587_v47 }
 0x2a8   : > { %v663_v52 = vpop.f32.mrb[0].mxu1 }
 0x2a9   : > { %v664_v53 = vadd.f32 %v809_v49, %v663_v52  ;;  %v847_v54 = vpop.f32.mrb[1].mxu1 }
 0x2ab   : > { %v673_v55 = vsel %vm672_vm13, %v664_v53, 0.0  ;;  %v690_v56 = vmul.f32 %v688_v51, %v664_v53 }
 0x2ac   : > { %709 = vst.msk [vmem:[#allocation10] sm:$0xf] %vm426_vm7, %v673_v55 }
 0x2ad   : > { %v692_v57 = vrot.slane %v690_v56, 4 }
 0x2af   : > { %v694_v59 = vsel %vm426_vm7, %v692_v57, 0.0 }
 0x2b0   : > { %v695_v60 = vrot.slane %v694_v59, 4 }
 0x2b2   : > { %v696_v61 = vadd.f32 %v695_v60, %v694_v59 }
 0x2b4   : > { %v697_v62 = vrot.slane %v696_v61, 2 }
 0x2b6   : > { %v698_v63 = vadd.f32 %v697_v62, %v696_v61 }
 0x2b8   : > { %v699_v0 = vrot.slane %v698_v63, 1 }
 0x2ba   : > { %v700_v1 = vadd.f32 %v699_v0, %v698_v63 }
 0x2bc   : > { %v708_v3 = vmul.f32 %v913_v2, %v700_v1 }
 0x2be   : > { %711 = vst.msk [vmem:[#allocation10 + $0x4] sm:$0x1] %vm710_vm14, %v708_v3 }
 0x2bf PF: > { %p883_p11 = scmp.eq.s32.totalorder %s1073_s25, 2  ;;  %s1026_s29 = smov [#allocation10]  }
 0x2c0   : > { %s719_s9 = sshll.u32 %s1026_s29, 4  ;;  %s720_s9 = int_to_ptr.vmem [resolvable:$true] %s719_s9 }
 0x2c1   : > { %s970_s10 = scalar_lea.vmem %s720_s9, 128  ;;  %p977_p1 = scmp.lt.s32.totalorder %s720_s9, %s720_s9 }
 0x2c2   : > { %p971_p12 = scmp.ne.s32.totalorder %s720_s9, %s970_s10  ;;  %p978_p5 = scmp.lt.s32.totalorder %s970_s10, %s970_s10 }
 0x2c4   : > { %p972_p13 = pnand %p971_p12, %p883_p11  ;;  %p979_p7 = por %p978_p5, %p977_p1 }
 0x2c6   : > { %p973_p0 = pneg %p972_p13 }
 0x2c8   : > { %p980_p2 = pnand %p979_p7, %p973_p0 }
 0x2ca   : > { %983 = shalt.err (!%p980_p2)
}
 0x2cb   : > { %s984_s12 = scalar_lea.hbm %s1241_s7, 128 }
 0x2cc   : > { %p985_p8 = scmp.ne.s32.totalorder %s1241_s7, %s984_s12  ;;  %p990_p9 = scmp.lt.u32.totalorder %s984_s12, %s1241_s7 }
 0x2ce   : > { %p986_p3 = pnand %p985_p8, %p883_p11 }
 0x2d0   : > { %p987_p4 = pneg %p986_p3 }
 0x2d2   : > { %p992_p6 = pnand %p990_p9, %p987_p4 }
 0x2d4   : > { %995 = shalt.err (!%p992_p6)
}
 0x2d5   : > { %869 = dma.vmem_to_hbm [thread:$0]  (%p883_p11), %s720_s9, 128, %s1241_s7, [#allocation7]  }
 0x2d6   : > { %1009 = dma.done.wait (%p883_p11), [#allocation7], 128  }
 0x2d7   : > { %1011 = vsyncadd (%p883_p11), [#allocation7], 4294967168 }
 0x2d8 PF: > { %s20_s24 = sadd.s32 1, %s1014_s24  }
 0x2d9   : > { %p17_p10 = scmp.ge.s32.totalorder %s20_s24, 5  }
 0x2db   :  { %19 = sbr.rel (!%p17_p10) target bundleno = 3 (0x3), region = 95 }
 0x2e2   :  { %732 = vsyncpa [#allocation6], 1 }
 0x2e3   :  { %734 = vsyncpa [#allocation6 + $0x1], 1 }
 0x2e4   :  { %735 = vsyncpa [#allocation9], 1 }
 0x2e5   :  { %736 = vsyncpa [#allocation7], 1 }
 0x2e6   :  { %738 = vsyncpa [#allocation7 + $0x1], 1 }

</bundles_post_ra>
